<compile_context>
chip_gen: v7x
topology: tpu7x:2x2x1
jax: 0.10.0
libtpu: 0.0.40
codegen_flags: <defaults>
</compile_context>

<pallas_src>
import functools
import math

import jax
import jax.numpy as jnp
from jax import lax
from jax.experimental import pallas as pl
from jax.experimental.pallas import tpu as pltpu


def _cdiv(a, b):
    return -(-a // b)


def _temporal_embed_kernel(*refs, nt, use_w1):
    # refs (use_w1=True ): x2, w0, w1, bias, out
    # refs (use_w1=False): x2, w0,     bias, out
    # x2 : (1, NB_in, RB*s*C_in)  whole (padded) batch element, VMEM-resident
    # w0 : (RB*s*C_in, RB*C_out)  banded weight: taps that stay in bundle r
    # w1 : (RB*s*C_in, RB*C_out)  banded weight: taps spilling into bundle r+1
    # b  : (1, RB*C_out)          bias tiled over the RB bundled rows (f32)
    # out: (1, NT, RB*C_out)      lane-dense output tile (last dim % 128 == 0)
    if use_w1:
        x2_ref, w0_ref, w1_ref, b_ref, o_ref = refs
    else:
        x2_ref, w0_ref, b_ref, o_ref = refs

    t = pl.program_id(1)
    start = pl.multiple_of(t * nt, nt)

    lhs0 = x2_ref[0, pl.ds(start, nt), :]
    acc = jnp.dot(lhs0, w0_ref[...], preferred_element_type=jnp.float32)
    if use_w1:  # static: taps spill into the next bundle iff K > stride
        lhs1 = x2_ref[0, pl.ds(start + 1, nt), :]
        acc = acc + jnp.dot(lhs1, w1_ref[...], preferred_element_type=jnp.float32)

    # bias add + final cast in f32 (v5e has no bf16 VPU).
    o_ref[0] = (acc + b_ref[...]).astype(o_ref.dtype)


def _choose_row_bundle(c_in, c_out, k, s):
    # Smallest RB such that RB*C_out % 128 == 0 (lane-dense output stores),
    # contraction depth RB*s*C_in >= 32, and RB*s >= K (kernel taps spill into
    # at most one neighbouring bundle).  Larger RB => deeper contraction and
    # denser input lanes, at the cost of more structurally-zero MXU FLOPs and
    # more padded output rows when L_out is small (kernel stays HBM-bound at
    # these channel counts either way, so keep RB minimal).
    rb = 128 // math.gcd(c_out, 128)
    while rb * s * c_in < 32 or rb * s < k:
        rb *= 2
    return rb


def temporal_embedding(x, weight, bias, *, stride, padding,
                       compute_dtype=jnp.float32, nt_target=256):
    """x: (B, L, C_in). weight: (C_out, C_in, K) (PyTorch Conv1d layout).
    bias: (C_out,). Returns (B, L_out, C_out) in x.dtype."""
    B, L, C_in = x.shape
    C_out, C_in_w, K = weight.shape
    assert C_in == C_in_w
    s, p = stride, padding
    L_out = (L + 2 * p - K) // s + 1
    assert L_out > 0

    RB = _choose_row_bundle(C_in, C_out, K, s)
    CIN_B = RB * s * C_in          # fused contraction depth
    COUT_B = RB * C_out            # lane-dense output width (multiple of 128)

    nb_out = _cdiv(L_out, RB)
    if nb_out <= nt_target:
        nt, n_tiles = nb_out, 1                              # single full-dim L tile
    else:
        nt, n_tiles = nt_target, _cdiv(nb_out, nt_target)    # nt_target % 8 == 0
    nb_pad = nt * n_tiles
    nb_in = nb_pad + 1                                       # +1 bundle of halo rows
    total_rows = nb_in * RB * s

    # --- wrapper glue: one pad + free reshapes (NO K-tap replication) ---------
    right = total_rows - L - p
    assert right >= 0
    x_c = x.astype(compute_dtype)
    x_full = jnp.pad(x_c, ((0, 0), (p, right), (0, 0)))      # conv pad + tail zeros
    x2 = x_full.reshape(B, nb_in, CIN_B)                     # metadata-only reshape

    # --- banded (block-Toeplitz) weights, built once outside the kernel ------
    w_t = jnp.transpose(weight, (2, 1, 0)).astype(compute_dtype)   # (K, C_in, C_out)
    D = (RB - 1) * s + K
    T = jnp.zeros((max(D, RB * s), C_in, RB, C_out), compute_dtype)
    for dr in range(RB):
        T = T.at[dr * s: dr * s + K, :, dr, :].set(w_t)
    W0 = T[:RB * s].reshape(CIN_B, COUT_B)
    use_w1 = D > RB * s
    if use_w1:
        T1 = T[RB * s:]
        T1 = jnp.pad(T1, ((0, RB * s - T1.shape[0]), (0, 0), (0, 0), (0, 0)))
        W1 = T1.reshape(CIN_B, COUT_B)
    b_tiled = jnp.tile(bias.astype(jnp.float32), RB).reshape(1, COUT_B)

    # --- VMEM budget (explicit, re-derived for v7x's 64 MiB) ------------------
    esize = jnp.dtype(compute_dtype).itemsize
    out_esize = jnp.dtype(x.dtype).itemsize
    n_w = 2 if use_w1 else 1
    vmem_bytes = (2 * nb_in * CIN_B * esize            # resident input (double-buffered)
                  + 2 * n_w * CIN_B * COUT_B * esize   # banded weights
                  + 2 * COUT_B * 4                     # bias
                  + 2 * nt * COUT_B * out_esize)       # output tile (double-buffered)
    # TODO(synk): for very long sequences, stream the L axis of the input with a
    # halo'd manual DMA (pl.ANY + make_async_copy) instead of keeping the whole
    # batch element resident in VMEM.
    assert vmem_bytes < 40 * 1024 * 1024, "sequence too long for resident-input variant"
    vmem_limit = min(max(4 * vmem_bytes + (8 << 20), 32 << 20), 48 << 20)

    # Advisory cost hint for the XLA scheduler around the custom call.
    flops = 2 * B * nb_pad * CIN_B * COUT_B * n_w
    bytes_accessed = (B * nb_in * CIN_B * esize
                      + n_w * CIN_B * COUT_B * esize
                      + COUT_B * 4
                      + B * nb_pad * COUT_B * out_esize)
    cost = pl.CostEstimate(flops=int(flops), transcendentals=0,
                           bytes_accessed=int(bytes_accessed))

    w_spec = pl.BlockSpec((CIN_B, COUT_B), lambda b, t: (0, 0))
    in_specs = [pl.BlockSpec((1, nb_in, CIN_B), lambda b, t: (b, 0, 0)), w_spec]
    operands = [x2, W0]
    if use_w1:
        in_specs.append(w_spec)
        operands.append(W1)
    in_specs.append(pl.BlockSpec((1, COUT_B), lambda b, t: (0, 0)))
    operands.append(b_tiled)

    kernel = functools.partial(_temporal_embed_kernel, nt=nt, use_w1=use_w1)
    out = pl.pallas_call(
        kernel,
        out_shape=jax.ShapeDtypeStruct((B, nb_pad, COUT_B), x.dtype),
        grid_spec=pltpu.PrefetchScalarGridSpec(
            num_scalar_prefetch=0,
            grid=(B, n_tiles),
            in_specs=in_specs,
            out_specs=pl.BlockSpec((1, nt, COUT_B), lambda b, t: (b, t, 0)),
        ),
        compiler_params=pltpu.CompilerParams(
            dimension_semantics=("parallel", "parallel"),
            vmem_limit_bytes=vmem_limit,
        ),
        cost_estimate=cost,
    )(*operands)

    # Free bitcast back to (B, L_out_padded, C_out), then drop the padded rows.
    out = out.reshape(B, nb_pad * RB, C_out)[:, :L_out, :]
    return out


def _reference(x, weight, bias, *, stride, padding):
    # PyTorch semantics: x.transpose(1,2) -> Conv1d -> transpose(1,2)
    x_ncl = jnp.transpose(x, (0, 2, 1))          # (B, C_in, L)
    y = lax.conv_general_dilated(
        x_ncl, weight,
        window_strides=(stride,),
        padding=[(padding, padding)],
        dimension_numbers=("NCH", "OIH", "NCH"),
    )
    y = y + bias[None, :, None]
    return jnp.transpose(y, (0, 2, 1))           # (B, L_out, C_out)


if __name__ == "__main__":
    B, L = 2, 16
    in_channels, out_channels = 4, 32
    kernel_size, stride, padding = 3, 1, 1

    key = jax.random.PRNGKey(0)
    kx, kw, kb = jax.random.split(key, 3)
    x = jax.random.normal(kx, (B, L, in_channels), dtype=jnp.float32)

    fan_in = in_channels * kernel_size
    bound = 1.0 / math.sqrt(fan_in)
    weight = jax.random.uniform(
        kw, (out_channels, in_channels, kernel_size),
        minval=-bound, maxval=bound, dtype=jnp.float32)
    bias = jax.random.uniform(
        kb, (out_channels,), minval=-bound, maxval=bound, dtype=jnp.float32)

    ref = _reference(x, weight, bias, stride=stride, padding=padding)

    # f32 operands (tight-tolerance correctness check).
    out = temporal_embedding(x, weight, bias, stride=stride, padding=padding,
                             compute_dtype=jnp.float32)
    out = jax.block_until_ready(out)
    assert out.shape == ref.shape, (out.shape, ref.shape)
    assert jnp.allclose(out, ref, atol=1e-4, rtol=1e-4), "f32 mismatch vs reference conv"

    # bf16 operands + f32 accumulate (the bandwidth-bound v6e/v7x configuration).
    out_bf16 = temporal_embedding(x, weight, bias, stride=stride, padding=padding,
                                  compute_dtype=jnp.bfloat16)
    out_bf16 = jax.block_until_ready(out_bf16)
    assert jnp.allclose(out_bf16, ref, atol=5e-2, rtol=5e-2), "bf16 mismatch vs reference conv"

    # Stride-2 / larger-K configuration exercises the use_w1=False single-matmul path.
    k2, s2, p2 = 4, 4, 2
    w2 = jax.random.uniform(kw, (out_channels, in_channels, k2),
                            minval=-bound, maxval=bound, dtype=jnp.float32)
    ref2 = _reference(x, w2, bias, stride=s2, padding=p2)
    out2 = temporal_embedding(x, w2, bias, stride=s2, padding=p2,
                              compute_dtype=jnp.float32)
    out2 = jax.block_until_ready(out2)
    assert out2.shape == ref2.shape, (out2.shape, ref2.shape)
    assert jnp.allclose(out2, ref2, atol=1e-4, rtol=1e-4), "strided mismatch vs reference conv"

    print("KERNEL_OK")
</pallas_src>

<mosaic_0001>
module attributes {stable_mosaic.version = 11 : i64} {
  func.func @_temporal_embed_kernel(%arg0: i32, %arg1: i32, %arg2: memref<1x3x32xf32, #tpu.memory_space<vmem>>, %arg3: memref<32x256xf32, #tpu.memory_space<vmem>>, %arg4: memref<32x256xf32, #tpu.memory_space<vmem>>, %arg5: memref<1x256xf32, #tpu.memory_space<vmem>>, %arg6: memref<1x2x256xf32, #tpu.memory_space<vmem>>) attributes {dimension_semantics = [#tpu.dimension_semantics<parallel>, #tpu.dimension_semantics<parallel>], iteration_bounds = array<i64: 2, 1>, scalar_prefetch = 0 : i64, scratch_operands = 0 : i64, tpu.core_type = #tpu.core_type<tc>, window_params = [{transform_indices = @transform_0, window_bounds = array<i64: 1, 3, 32>}, {pipeline_mode = #tpu.pipeline_mode<synchronous>, transform_indices = @transform_1, window_bounds = array<i64: 32, 256>}, {pipeline_mode = #tpu.pipeline_mode<synchronous>, transform_indices = @transform_2, window_bounds = array<i64: 32, 256>}, {pipeline_mode = #tpu.pipeline_mode<synchronous>, transform_indices = @transform_3, window_bounds = array<i64: 1, 256>}, {transform_indices = @transform_4, window_bounds = array<i64: 1, 2, 256>}]} {
    %c2_i32 = arith.constant 2 : i32
    %0 = arith.muli %arg1, %c2_i32 : i32
    %1 = tpu.assume_multiple %0, 2 : i32
    %c0 = arith.constant 0 : index
    %2 = arith.index_cast %1 : i32 to index
    %c0_0 = arith.constant 0 : index
    %3 = vector.load %arg2[%c0, %2, %c0_0] : memref<1x3x32xf32, #tpu.memory_space<vmem>>, vector<1x2x32xf32>
    %4 = vector.shape_cast %3 : vector<1x2x32xf32> to vector<2x32xf32>
    %c0_1 = arith.constant 0 : index
    %c0_2 = arith.constant 0 : index
    %5 = vector.load %arg3[%c0_1, %c0_2] : memref<32x256xf32, #tpu.memory_space<vmem>>, vector<32x256xf32>
    %cst = arith.constant dense<0.000000e+00> : vector<2x256xf32>
    %6 = tpu.matmul %4, %5, %cst {dimension_numbers = #tpu.dot_dimension_numbers<[1], [0], [0], [1], [0, 0, 1, 1], [], []>} : vector<2x32xf32>, vector<32x256xf32>, vector<2x256xf32> -> vector<2x256xf32>
    %c1_i32 = arith.constant 1 : i32
    %7 = arith.addi %1, %c1_i32 : i32
    %c0_3 = arith.constant 0 : index
    %8 = arith.index_cast %7 : i32 to index
    %c0_4 = arith.constant 0 : index
    %9 = vector.load %arg2[%c0_3, %8, %c0_4] : memref<1x3x32xf32, #tpu.memory_space<vmem>>, vector<1x2x32xf32>
    %10 = vector.shape_cast %9 : vector<1x2x32xf32> to vector<2x32xf32>
    %c0_5 = arith.constant 0 : index
    %c0_6 = arith.constant 0 : index
    %11 = vector.load %arg4[%c0_5, %c0_6] : memref<32x256xf32, #tpu.memory_space<vmem>>, vector<32x256xf32>
    %cst_7 = arith.constant dense<0.000000e+00> : vector<2x256xf32>
    %12 = tpu.matmul %10, %11, %cst_7 {dimension_numbers = #tpu.dot_dimension_numbers<[1], [0], [0], [1], [0, 0, 1, 1], [], []>} : vector<2x32xf32>, vector<32x256xf32>, vector<2x256xf32> -> vector<2x256xf32>
    %13 = arith.addf %6, %12 : vector<2x256xf32>
    %c0_8 = arith.constant 0 : index
    %c0_9 = arith.constant 0 : index
    %14 = vector.load %arg5[%c0_8, %c0_9] : memref<1x256xf32, #tpu.memory_space<vmem>>, vector<1x256xf32>
    %15 = vector.broadcast %14 : vector<1x256xf32> to vector<2x256xf32>
    %16 = arith.addf %13, %15 : vector<2x256xf32>
    %c0_10 = arith.constant 0 : index
    %c0_11 = arith.constant 0 : index
    %c0_12 = arith.constant 0 : index
    %17 = vector.load %arg6[%c0_10, %c0_11, %c0_12] : memref<1x2x256xf32, #tpu.memory_space<vmem>>, vector<1x2x256xf32>
    %18 = vector.shape_cast %17 : vector<1x2x256xf32> to vector<2x256xf32>
    %19 = vector.shape_cast %16 : vector<2x256xf32> to vector<1x2x256xf32>
    tpu.vector_store %arg6[%c0_10, %c0_11, %c0_12], %19 {strides = array<i32>} : memref<1x2x256xf32, #tpu.memory_space<vmem>>, vector<1x2x256xf32>,
    return
  }
  func.func @transform_0(%arg0: i32, %arg1: i32) -> (i32, i32, i32) {
    %c0_i32 = arith.constant 0 : i32
    %c0_i32_0 = arith.constant 0 : i32
    %c0_i32_1 = arith.constant 0 : i32
    return %arg0, %c0_i32, %c0_i32_0 : i32, i32, i32
  }
  func.func @transform_1(%arg0: i32, %arg1: i32) -> (i32, i32) {
    %c0_i32 = arith.constant 0 : i32
    %c0_i32_0 = arith.constant 0 : i32
    %c0_i32_1 = arith.constant 0 : i32
    return %c0_i32, %c0_i32_0 : i32, i32
  }
  func.func @transform_2(%arg0: i32, %arg1: i32) -> (i32, i32) {
    %c0_i32 = arith.constant 0 : i32
    %c0_i32_0 = arith.constant 0 : i32
    %c0_i32_1 = arith.constant 0 : i32
    return %c0_i32, %c0_i32_0 : i32, i32
  }
  func.func @transform_3(%arg0: i32, %arg1: i32) -> (i32, i32) {
    %c0_i32 = arith.constant 0 : i32
    %c0_i32_0 = arith.constant 0 : i32
    %c0_i32_1 = arith.constant 0 : i32
    return %c0_i32, %c0_i32_0 : i32, i32
  }
  func.func @transform_4(%arg0: i32, %arg1: i32) -> (i32, i32, i32) {
    %c0_i32 = arith.constant 0 : i32
    %c0_i32_0 = arith.constant 0 : i32
    return %arg0, %arg1, %c0_i32 : i32, i32, i32
  }
}

</mosaic_0001>

<bundles_post_ra>
// kernel: tpu_custom_call.1
= control target key start
LH: loop header
LB: loop body
LE: loop exit
PB: predicated region body
PF: predicated region fallthrough
CT: control target
= control target key end

     0   :  { %9 = vsyncpa [#allocation3], 0  ;;  %s1034_s0 = inlined_call_operand.vmem [shape: f32[2,3,32], index: 0, kind: input, shape index: {}]   ;;  %s1035_s1 = inlined_call_operand.hbm [shape: f32[32,256], index: 1, kind: input, shape index: {}]   ;;  %s1036_s2 = inlined_call_operand.hbm [shape: f32[32,256], index: 2, kind: input, shape index: {}]   ;;  %s1037_s3 = inlined_call_operand.vmem [shape: f32[1,256], index: 3, kind: input, shape index: {}]   ;;  %s1038_s4 = inlined_call_operand.hbm [shape: f32[2,2,256], index: 4, kind: output, shape index: {}]  }
   0x1   :  { %10 = vsyncpa [#allocation6], 0 }
   0x2   :  { %11 = vsyncpa [#allocation4], 0 }
   0x3   :  { %13 = vsyncpa [#allocation4 + $0x1], 0  ;;  %s841_s15 = smov 0   ;;  %s843_s16 = smov 0  }
   0x4   :  { %s845_s17 = smov 0   ;;  %s847_s18 = smov 0  }
   0x5   :  { %s849_s19 = smov 0   ;;  %s851_s20 = smov 0  }
   0x6 LB: > { %s548_s21 = sadd.s32 4294967295, %s808_s20   ;;  %s549_s22 = sadd.s32 4294967294, %s808_s20   ;;  %s808_s20 = sphi %s851_s20, %s19_s20   ;;  %s804_s19 = sphi %s849_s19, %s1056_s19   ;;  %s800_s18 = sphi %s847_s18, %s1055_s18   ;;  %s796_s17 = sphi %s845_s17, %s1054_s17   ;;  %s792_s16 = sphi %s843_s16, %s1053_s16   ;;  %s788_s15 = sphi %s841_s15, %s1052_s15  }
   0x7   : > { %s31_s23 = sadd.s32 1, %s804_s19  ;;  %s129_s24 = sadd.s32 1, %s796_s17 }
   0x8   : > { %p33_p0 = scmp.ge.s32.totalorder %s31_s23, 2  ;;  %p139_p1 = scmp.ne.s32.totalorder %s796_s17, %s792_s16 }
   0x9   : > { %p140_p2 = scmp.eq.s32.totalorder %s548_s21, 1  ;;  %p145_p3 = scmp.ne.s32.totalorder %s792_s16, %s788_s15 }
   0xa   : > { %s1058_s23 = smov (%p33_p0, %s31_s23), 0  ;;  %p146_p5 = scmp.eq.s32.totalorder %s549_s22, 1 }
   0xb   : > { %p881_p4 = por %p140_p2, %p139_p1  ;;  %s124_s26 = ssub.s32 %s804_s19, %s1058_s23 }
   0xc   : > { %p550_p6 = scmp.ge.s32.totalorder %s808_s20, 1  ;;  %p127_p7 = scmp.eq.s32.totalorder %s124_s26, 0 }
   0xd   : > { %s1043_s25 = scalar_select %p881_p4, 1, 0 }
   0xe   : > { %p888_p8 = por %p146_p5, %p145_p3  ;;  %p153_p9 = scmp.lt.s32.totalorder %s808_s20, 3 }
   0xf   : > { %s894_s28 = scalar_select %p127_p7, %s796_s17, %s129_s24  }
  0x10   : > { %s1044_s27 = scalar_select %p888_p8, 1, 0 }
  0x11   : > { %p896_p10 = pnand %p550_p6, %p153_p9  ;;  %p900_p11 = scmp.eq.s32.totalorder %s548_s21, 0 }
  0x12   : > { %s810_s5 = smov [#allocation2]   ;;  %s811_s8 = smov [#allocation5]  }
  0x13   : > { %s1045_s29 = scalar_select %p896_p10, 1, 0 }
  0x14   : > { %s1046_s30 = scalar_select %p900_p11, 1, 0 }
  0x15   : > { %p597_p12 = pneg %p896_p10  ;;  %s165_s6 = sshll.u32 %s810_s5, 4  ;;  %s166_s6 = int_to_ptr.vmem [resolvable:$true] %s165_s6 }
  0x16   : > { %s178_s9 = sshll.u32 %s811_s8, 4  ;;  %s666_s12 = scalar_lea.hbm %s1035_s1, 1024  ;;  %s912_s9 = int_to_ptr.vmem [resolvable:$true] %s178_s9 }
  0x17   : > { %p908_p13 = pnand %p900_p11, %p597_p12  ;;  %p667_p0 = scmp.ne.s32.totalorder %s1035_s1, %s666_s12 }
  0x18   : > { %p673_p5 = scmp.lt.u32.totalorder %s666_s12, %s1035_s1 }
  0x19   : > { %p668_p1 = pneg %p908_p13 }
  0x1b   : > { %p669_p2 = pnand %p668_p1, %p667_p0 }
  0x1d   : > { %p670_p3 = pneg %p669_p2 }
  0x1f   : > { %p675_p6 = pnand %p673_p5, %p670_p3 }
  0x21   : > { %678 = shalt.err (!%p675_p6)
}
  0x22   : > { %s679_s24 = scalar_lea.vmem %s166_s6, 1024  ;;  %p687_p8 = scmp.lt.s32.totalorder %s166_s6, %s166_s6 }
  0x23   : > { %p680_p7 = scmp.ne.s32.totalorder %s166_s6, %s679_s24  ;;  %p688_p4 = scmp.lt.s32.totalorder %s679_s24, %s679_s24 }
  0x25   : > { %p682_p9 = pnand %p680_p7, %p668_p1  ;;  %p689_p11 = por %p688_p4, %p687_p8 }
  0x27   : > { %p683_p12 = pneg %p682_p9 }
  0x29   : > { %p690_p10 = pnand %p689_p11, %p683_p12 }
  0x2b   : > { %693 = shalt.err (!%p690_p10)
}
  0x2c   : > { %s812_s26 = smov 256   ;;  %s813_s5 = smov 16  }
  0x2d   : > { %600 = dma.hbm_to_vmem [thread:$0]  (!%p908_p13), %s1035_s1, 1024, %s166_s6, [#allocation3], %s812_s26, %s812_s26, %s813_s5  }
  0x2e   : > { %s694_s13 = scalar_lea.hbm %s1036_s2, 1024 }
  0x2f   : > { %p695_p0 = scmp.ne.s32.totalorder %s1036_s2, %s694_s13  ;;  %p701_p10 = scmp.lt.u32.totalorder %s694_s13, %s1036_s2 }
  0x31   : > { %p697_p4 = pnand %p695_p0, %p668_p1 }
  0x33   : > { %p698_p8 = pneg %p697_p4 }
  0x35   : > { %p703_p11 = pnand %p701_p10, %p698_p8 }
  0x37   : > { %706 = shalt.err (!%p703_p11)
}
  0x38   : > { %s707_s6 = scalar_lea.vmem %s912_s9, 1024  ;;  %p715_p6 = scmp.lt.s32.totalorder %s912_s9, %s912_s9 }
  0x39   : > { %p708_p2 = scmp.ne.s32.totalorder %s912_s9, %s707_s6  ;;  %p716_p7 = scmp.lt.s32.totalorder %s707_s6, %s707_s6 }
  0x3b   : > { %p710_p3 = pnand %p708_p2, %p668_p1  ;;  %p717_p9 = por %p716_p7, %p715_p6 }
  0x3d   : > { %p711_p5 = pneg %p710_p3 }
  0x3f   : > { %p718_p12 = pnand %p717_p9, %p711_p5 }
  0x41   : > { %721 = shalt.err (!%p718_p12)
}
  0x42   : > { %603 = dma.hbm_to_vmem [thread:$0]  (!%p908_p13), %s1036_s2, 1024, %s912_s9, [#allocation6], %s812_s26, %s812_s26, %s813_s5  }
  0x43   : > { %p1048_p0 = scmp.ne.s32.totalorder %s1045_s29, 0 }
  0x44   : > { %p1049_p4 = scmp.ne.s32.totalorder (!%p1048_p0), %s1046_s30, 0 }
  0x45   : > { %204 = sbr.rel (%p1048_p0) target bundleno = 325 (0x145), region = 36 }
  0x4c   : > { %775 = dma.done.wait (%p1049_p4), [#allocation3], 1024  }
  0x4d   : > { %777 = vsyncadd (%p1049_p4), [#allocation3], 4294966272 }
  0x4e   : > { %779 = dma.done.wait (%p1049_p4), [#allocation6], 1024  }
  0x4f   : > { %781 = vsyncadd (%p1049_p4), [#allocation6], 4294966272  ;;  %v814_v0 = vmov 0.0   ;;  %p233_p13 = scmp.lt.s32.totalorder %s800_s18, 1  ;;  %v252_v1 = vld [vmem:[#allocation5 + $0x8] sm:$0xff]  ;;  %v254_v2 = vld [vmem:[#allocation5 + $0x18] sm:$0xff]  ;;  %v410_v27 = vlaneseq }
  0x50   : > { %327 = vmatprep.mubr.f32.mxu1 %v814_v0  ;;  %401 = vmatprep.mubr.f32.mxu0 %v814_v0  ;;  %v241_v3 = vld [vmem:[#allocation2 + $0x8] sm:$0xff]  ;;  %v569_v4 = vpack.c.bf16 %v254_v2, %v252_v1  ;;  %v243_v5 = vld [vmem:[#allocation2 + $0x18] sm:$0xff]  ;;  %v251_v6 = vld [vmem:[#allocation5] sm:$0xff]  ;;  %vm259_vm0 = vcmask 261120   ;;  %s230_s5 = sand.u32 1, %s792_s16   ;;  %s568_s14 = sshll.u32 %s800_s18, 6 }
  0x51   : > { %s973_s29 = scalar_select %p233_p13, %s800_s18, 1  ;;  %v253_v7 = vld [vmem:[#allocation5 + $0x10] sm:$0xff]  ;;  %v577_v8 = vpack.c.bf16 %v243_v5, %v241_v3  ;;  %v240_v10 = vld [vmem:[#allocation2] sm:$0xff]  ;;  %v256_v12 = vld [vmem:[#allocation5 + $0x28] sm:$0xff]  ;;  %v411_v28 = vshrl.u32 %v410_v27, 7 }
  0x52   : > { %v571_v9 = vpack.c.bf16 %v253_v7, %v251_v6  ;;  %v242_v11 = vld [vmem:[#allocation2 + $0x10] sm:$0xff]  ;;  %570 = vmatprep.subr.bf16.mxu1 %v569_v4  ;;  %v258_v14 = vld [vmem:[#allocation5 + $0x38] sm:$0xff]  ;;  %v245_v15 = vld [vmem:[#allocation2 + $0x28] sm:$0xff]  ;;  %s557_s13 = sshll.u32 %s230_s5, 2  ;;  %s987_s8 = scalar_lea.hbm %s1038_s4, %s568_s14 }
  0x53   : > { %s558_s30 = sshll.u32 %s973_s29, 2  ;;  %v579_v13 = vpack.c.bf16 %v242_v11, %v240_v10  ;;  %v247_v16 = vld [vmem:[#allocation2 + $0x38] sm:$0xff]  ;;  %578 = vmatprep.subr.bf16.mxu0 %v577_v8  ;;  %v573_v17 = vpack.c.bf16 %v258_v14, %v256_v12  ;;  %v255_v19 = vld [vmem:[#allocation5 + $0x20] sm:$0xff]  ;;  %v257_v20 = vld [vmem:[#allocation5 + $0x30] sm:$0xff]  ;;  %v412_v29 = vsub.s32 0, %v411_v28  ;;  %v416_v31 = vsub.s32 1, %v411_v28 }
  0x54   : > { %572 = vmatpush1.bf16.msra.mxu1 %v571_v9  ;;  %v581_v18 = vpack.c.bf16 %v247_v16, %v245_v15  ;;  %v244_v21 = vld [vmem:[#allocation2 + $0x20] sm:$0xff]  ;;  %v575_v22 = vpack.c.bf16 %v257_v20, %v255_v19  ;;  %v246_v23 = vld [vmem:[#allocation2 + $0x30] sm:$0xff]  ;;  %s236_s26 = scalar_lea.vmem %s1034_s0, %s558_s30  ;;  %v408_v30 = vld [vmem:[%s1037_s3] sm:$0x3]  ;;  %s232_s21 = scalar_lea.vmem [#allocation7], %s557_s13 }
  0x55   : > { %580 = vmatpush1.bf16.msra.mxu0 %v579_v13  ;;  %574 = vmatprep.subr.bf16.mxu1 %v573_v17  ;;  %v583_v24 = vpack.c.bf16 %v246_v23, %v244_v21  ;;  %v559_v25 = vld [vmem:[%s236_s26 + $0x1] sm:$0x3]  ;;  %v413_v33 = vrot.slane %v408_v30, %v412_v29  ;;  %v417_v36 = vrot.slane %v408_v30, %v416_v31  ;;  %s451_s22 = sshll.u32 %s232_s21, 4  ;;  %s435_s10 = scalar_lea.sflag [#allocation4], %s230_s5  ;;  %s989_s22 = int_to_ptr.vmem [resolvable:$true] %s451_s22 }
  0x56   : > { %582 = vmatprep.subr.bf16.mxu0 %v581_v18  ;;  %v239_v26 = vld [vmem:[%s236_s26] sm:$0x3]  ;;  %s722_s29 = scalar_lea.vmem %s989_s22, 64  ;;  %p1050_p8 = scmp.ne.s32.totalorder %s1043_s25, 0 }
  0x57   : > { %p723_p1 = scmp.ne.s32.totalorder %s989_s22, %s722_s29  ;;  %s815_s18 = smov [#allocation7]  }
  0x58   : > { %576 = vmatpush1.bf16.msra.mxu1 %v575_v22  ;;  %s726_s30 = sshll.u32 %s815_s18, 4  ;;  %s727_s30 = int_to_ptr.vmem [resolvable:$false] %s726_s30 }
  0x59   : > { %584 = vmatpush1.bf16.msra.mxu0 %v583_v24  ;;  %p724_p10 = pnand %p723_p1, %p1050_p8  ;;  %s728_s7 = scalar_lea.vmem %s727_s30, 128 }
  0x5a   : > { %p729_p2 = scmp.lt.s32.totalorder %s989_s22, %s727_s30  ;;  %p730_p3 = scmp.lt.s32.totalorder %s728_s7, %s722_s29 }
  0x5b   : > { %560 = vmatmul.mubr.msk.f32.vlgmr.msra.gmra.mrb[0].mxu1 %vm259_vm0, %v559_v25  ;;  %p725_p11 = pneg %p724_p10 }
  0x5c   : > { %561 = vmatmul.mubr.msk.f32.vlgmr.msra.gmra.mrb[0].mxu0 %vm259_vm0, %v239_v26  ;;  %p731_p5 = por %p730_p3, %p729_p2 }
  0x5e   : > { %p732_p6 = pnand %p731_p5, %p725_p11 }
 0x12e   : > { %v329_v32 = vpop.f32.mrb[0].mxu1 }
 0x12f   : > { %v403_v34 = vpop.f32.mrb[0].mxu0  ;;  %v331_v35 = vpop.f32.mrb[1].mxu1 }
 0x130   : > { %v404_v37 = vadd.f32 %v403_v34, %v329_v32  ;;  %v405_v38 = vpop.f32.mrb[1].mxu0 }
 0x131   : > { %v406_v39 = vadd.f32 %v405_v38, %v331_v35 }
 0x132   : > { %v420_v40 = vadd.f32 %v413_v33, %v404_v37 }
 0x133   : > { %v421_v41 = vadd.f32 %v417_v36, %v406_v39 }
 0x135   : > { %v424_v42 = vcombine.low %v420_v40, %v421_v41 }
 0x137   : > { %562 = vst.sshfl [vmem:[%s232_s21] sm:$0x33 pattern:$0x76325410] %v424_v42 }
 0x138   : > { %735 = shalt.err (!%p732_p6)
}
 0x139   : > { %s736_s9 = scalar_lea.hbm %s987_s8, 64  ;;  %s740_s11 = scalar_lea.hbm %s1038_s4, 128 }
 0x13a   : > { %p737_p7 = scmp.ne.s32.totalorder %s987_s8, %s736_s9  ;;  %p741_p0 = scmp.lt.u32.totalorder %s987_s8, %s1038_s4 }
 0x13b   : > { %p742_p4 = scmp.lt.u32.totalorder %s740_s11, %s736_s9  ;;  %p744_p1 = scmp.lt.u32.totalorder %s736_s9, %s987_s8 }
 0x13c   : > { %p738_p9 = pnand %p737_p7, %p1050_p8 }
 0x13d   : > { %p743_p13 = por %p742_p4, %p741_p0 }
 0x13e   : > { %p739_p12 = pneg %p738_p9 }
 0x13f   : > { %p745_p10 = por %p744_p1, %p743_p13 }
 0x141   : > { %p746_p11 = pnand %p745_p10, %p739_p12 }
 0x143   : > { %749 = shalt.err (!%p746_p11)
}
 0x144   : > { %595 = dma.vmem_to_hbm [thread:$0]  (%p1050_p8), %s989_s22, 64, %s987_s8, %s435_s10  }
 0x145 PF: > { %p612_p2 = scmp.ge.s32.totalorder %s808_s20, 2  ;;  %s463_s14 = sand.u32 1, %s788_s15  }
 0x146   : > { %p1051_p3 = scmp.ne.s32.totalorder %s1044_s27, 0  ;;  %s464_s21 = scalar_lea.sflag [#allocation4], %s463_s14 }
 0x148   : > { %p605_p5 = pnand %p612_p2, %p1051_p3 }
 0x14a   : > { %783 = dma.done.wait (!%p605_p5), %s464_s21, 64  }
 0x14b   : > { %785 = vsyncadd (!%p605_p5), %s464_s21, 4294967232  ;;  %s19_s20 = sadd.s32 1, %s808_s20   ;;  %s1052_s15 = smov %s792_s16 }
 0x14c   : > { %p16_p6 = scmp.ge.s32.totalorder %s19_s20, 4   ;;  %s1053_s16 = smov %s796_s17 }
 0x14d   : > { %s1054_s17 = smov %s894_s28  ;;  %s1055_s18 = smov %s804_s19 }
 0x14e   : > { %s1056_s19 = smov %s1058_s23  ;;  %18 = sbr.rel (!%p16_p6) target bundleno = 6 (0x6), region = 82 }
 0x155   :  { %469 = vsyncpa [#allocation3], 1 }
 0x156   :  { %471 = vsyncpa [#allocation3 + $0x1], 1 }
 0x157   :  { %472 = vsyncpa [#allocation6], 1 }
 0x158   :  { %473 = vsyncpa [#allocation4], 1 }
 0x159   :  { %475 = vsyncpa [#allocation4 + $0x1], 1 }

</bundles_post_ra>
